<compile_context>
chip_gen: v7x
topology: tpu7x:2x2x1
jax: 0.10.0
libtpu: 0.0.40
codegen_flags: <defaults>
</compile_context>

<pallas_src>
import functools
import math

import jax
import jax.numpy as jnp
from jax import lax
from jax.experimental import pallas as pl
from jax.experimental.pallas import tpu as pltpu


def _round_up(x, m):
    return ((x + m - 1) // m) * m


def _pick_tile(dim, candidates):
    for c in candidates:
        if dim % c == 0:
            return c
    return dim


def _mosaic_params(dimension_semantics, est_bytes):
    kwargs = dict(dimension_semantics=dimension_semantics)
    if est_bytes > 12 * 1024 * 1024:
        # Default scoped VMEM (16/32/32 MiB on v5e/v6e/v7x) may be too small
        # for big H/V; unlock more, capped well under v7x's 64 MiB physical.
        kwargs["vmem_limit_bytes"] = int(min(2 * est_bytes, 56 * 1024 * 1024))
    return pltpu.CompilerParams(**kwargs)


# ---------------------------------------------------------------------------
# Fused kernel: sequential tanh-RNN recurrence + dense-projection epilogue.
#   xproj_ref : (TS, Bp, Hp) f32   precomputed input projection + fused biases
#   whh_ref   : (Hp, Hp)     bf16  W_hh^T (zero-padded)
#   h0_ref    : (Bp, Hp)     f32   initial hidden state
#   wd_ref    : (Hp, Vp)     bf16  W_dense^T (zero-padded)
#   bd_ref    : (1, Vp)      f32   dense bias
#   logits_ref: (TS, Bp, Vp) f32   output logits for this block of time steps
#   hT_ref    : (Bp, Hp)     f32   final hidden state (written on last block)
#   h_scratch : VMEM (Bp, Hp) f32  hidden state carried across grid iterations
#   y_scratch : VMEM (TS, Bp, Hp) f32  per-block hidden states (never hit HBM)
# ---------------------------------------------------------------------------
def rnn_fused_kernel(xproj_ref, whh_ref, h0_ref, wd_ref, bd_ref,
                     logits_ref, hT_ref, h_scratch, y_scratch, *, t_valid):
    ts, bp, hp = xproj_ref.shape
    blk = pl.program_id(0)

    @pl.when(blk == 0)
    def _():
        h_scratch[...] = h0_ref[...]

    def step(s, h):
        h_new = jnp.tanh(
            xproj_ref[s]
            + jnp.dot(h.astype(jnp.bfloat16), whh_ref[...],
                      preferred_element_type=jnp.float32))
        # Freeze h on padded time steps so hT is exactly h_{T-1}.
        h_new = jnp.where(blk * ts + s < t_valid, h_new, h)
        y_scratch[s] = h_new
        return h_new

    h_scratch[...] = lax.fori_loop(0, ts, step, h_scratch[...], unroll=True)

    # Dense epilogue: (TS*Bp, Hp) @ (Hp, Vp) + b, bf16 operands, f32 accum.
    y2 = y_scratch[...].reshape(ts * bp, hp).astype(jnp.bfloat16)
    logits = jnp.dot(y2, wd_ref[...], preferred_element_type=jnp.float32)
    logits_ref[...] = logits.reshape(ts, bp, -1) + bd_ref[...]

    @pl.when(blk == pl.num_programs(0) - 1)
    def _():
        hT_ref[...] = h_scratch[...]


# ---------------------------------------------------------------------------
# Fallback kernel 1 (large vocab): recurrence only, y emitted in bf16.
# ---------------------------------------------------------------------------
def rnn_recurrence_kernel(xproj_ref, whh_ref, h0_ref, y_ref, hT_ref,
                          h_scratch, *, t_valid):
    ts = xproj_ref.shape[0]
    blk = pl.program_id(0)

    @pl.when(blk == 0)
    def _():
        h_scratch[...] = h0_ref[...]

    def step(s, h):
        h_new = jnp.tanh(
            xproj_ref[s]
            + jnp.dot(h.astype(jnp.bfloat16), whh_ref[...],
                      preferred_element_type=jnp.float32))
        h_new = jnp.where(blk * ts + s < t_valid, h_new, h)
        y_ref[s] = h_new.astype(y_ref.dtype)          # bf16 HBM writeback
        return h_new

    h_scratch[...] = lax.fori_loop(0, ts, step, h_scratch[...], unroll=True)

    @pl.when(blk == pl.num_programs(0) - 1)
    def _():
        hT_ref[...] = h_scratch[...]


# ---------------------------------------------------------------------------
# Fallback kernel 2: dense projection with full-K tiles (no reduction axis).
# ---------------------------------------------------------------------------
def dense_kernel(y_ref, w_ref, b_ref, o_ref):
    o_ref[...] = (jnp.dot(y_ref[...], w_ref[...],
                          preferred_element_type=jnp.float32)
                  + b_ref[...]).astype(o_ref.dtype)


def rnn_model_forward(inputs, state, params, vocab_size, *, force_unfused=False):
    """Equivalent of RNNModel.forward (single-layer unidirectional tanh nn.RNN).

    inputs: (B, T) int32 token ids
    state : (1, B, H) float32 initial hidden state
    returns: (output (T*B, V), new_state (1, B, H))
    """
    B, T = inputs.shape
    H = params["w_hh"].shape[0]
    V = vocab_size

    # one-hot @ W_ih^T == embedding row gather; gather directly in (T, B, H)
    # layout and fuse both RNN biases into it.
    emb = params["w_ih"].T.astype(jnp.float32)                  # (V, H)
    brnn = (params["b_ih"] + params["b_hh"]).astype(jnp.float32)
    x_proj = jnp.take(emb, inputs.T, axis=0) + brnn             # (T, B, H) f32

    TS = T if T <= 32 else 32            # time steps per grid iteration
    B_p = _round_up(B, 8)                # f32 sublane
    H_p = _round_up(H, 128)              # lane-dense hidden dim
    V_p = _round_up(V, 128)              # lane-dense vocab dim
    T_p = _round_up(T, TS)

    def pad3(x, shape):
        if x.shape == shape:
            return x
        return jnp.zeros(shape, x.dtype).at[
            :x.shape[0], :x.shape[1], :x.shape[2]].set(x)

    def pad2(x, shape):
        if x.shape == shape:
            return x
        return jnp.zeros(shape, x.dtype).at[:x.shape[0], :x.shape[1]].set(x)

    x_proj_p = pad3(x_proj, (T_p, B_p, H_p))
    whh_p = pad2(params["w_hh"].T.astype(jnp.bfloat16), (H_p, H_p))
    h0_p = pad2(state[0].astype(jnp.float32), (B_p, H_p))
    wd_p = pad2(params["w_dense"].T.astype(jnp.bfloat16), (H_p, V_p))
    bd_p = pad2(params["b_dense"].astype(jnp.float32)[None, :], (1, V_p))

    # Rough double-buffered VMEM footprint of the fused kernel.
    fused_bytes = (2 * TS * B_p * H_p * 4        # x_proj blocks
                   + 2 * TS * B_p * V_p * 4      # logits blocks
                   + 2 * H_p * H_p * 2           # W_hh (bf16)
                   + 2 * H_p * V_p * 2           # W_dense (bf16)
                   + 2 * 2 * B_p * H_p * 4       # h0 in + hT out
                   + 2 * V_p * 4                 # bias
                   + B_p * H_p * 4               # h scratch
                   + TS * B_p * H_p * 4)         # y scratch
    use_fused = (not force_unfused) and fused_bytes <= 40 * 1024 * 1024

    if use_fused:
        logits_p, hT_p = pl.pallas_call(
            functools.partial(rnn_fused_kernel, t_valid=T),
            out_shape=(jax.ShapeDtypeStruct((T_p, B_p, V_p), jnp.float32),
                       jax.ShapeDtypeStruct((B_p, H_p), jnp.float32)),
            grid_spec=pltpu.PrefetchScalarGridSpec(
                num_scalar_prefetch=0,
                grid=(T_p // TS,),
                in_specs=[
                    pl.BlockSpec((TS, B_p, H_p), lambda i: (i, 0, 0)),  # x_proj
                    pl.BlockSpec((H_p, H_p), lambda i: (0, 0)),          # W_hh^T
                    pl.BlockSpec((B_p, H_p), lambda i: (0, 0)),          # h0
                    pl.BlockSpec((H_p, V_p), lambda i: (0, 0)),          # W_d^T
                    pl.BlockSpec((1, V_p), lambda i: (0, 0)),            # b_d
                ],
                out_specs=(pl.BlockSpec((TS, B_p, V_p), lambda i: (i, 0, 0)),
                           pl.BlockSpec((B_p, H_p), lambda i: (0, 0))),
                scratch_shapes=[pltpu.VMEM((B_p, H_p), jnp.float32),
                                pltpu.VMEM((TS, B_p, H_p), jnp.float32)],
            ),
            compiler_params=_mosaic_params(("arbitrary",), fused_bytes),
        )(x_proj_p, whh_p, h0_p, wd_p, bd_p)
    else:
        rec_bytes = (2 * TS * B_p * H_p * 4
                     + 2 * TS * B_p * H_p * 2
                     + 2 * H_p * H_p * 2
                     + 2 * 2 * B_p * H_p * 4
                     + B_p * H_p * 4)
        y_p, hT_p = pl.pallas_call(
            functools.partial(rnn_recurrence_kernel, t_valid=T),
            out_shape=(jax.ShapeDtypeStruct((T_p, B_p, H_p), jnp.bfloat16),
                       jax.ShapeDtypeStruct((B_p, H_p), jnp.float32)),
            grid_spec=pltpu.PrefetchScalarGridSpec(
                num_scalar_prefetch=0,
                grid=(T_p // TS,),
                in_specs=[
                    pl.BlockSpec((TS, B_p, H_p), lambda i: (i, 0, 0)),
                    pl.BlockSpec((H_p, H_p), lambda i: (0, 0)),
                    pl.BlockSpec((B_p, H_p), lambda i: (0, 0)),
                ],
                out_specs=(pl.BlockSpec((TS, B_p, H_p), lambda i: (i, 0, 0)),
                           pl.BlockSpec((B_p, H_p), lambda i: (0, 0))),
                scratch_shapes=[pltpu.VMEM((B_p, H_p), jnp.float32)],
            ),
            compiler_params=_mosaic_params(("arbitrary",), rec_bytes),
        )(x_proj_p, whh_p, h0_p)

        # Dense projection: feed the padded y buffer directly via a plain
        # reshape (no slice + re-pad HBM copy); full-K tiles, no acc scratch.
        M_p = T_p * B_p
        y2d = y_p.reshape(M_p, H_p)
        TM = _pick_tile(M_p, (512, 256, 128, 64, 32, 16, 8))
        TN = _pick_tile(V_p, (512, 256, 128))
        dense_bytes = (2 * TM * H_p * 2 + 2 * H_p * TN * 2
                       + 2 * TM * TN * 4 + 2 * TN * 4)
        logits2d = pl.pallas_call(
            dense_kernel,
            out_shape=jax.ShapeDtypeStruct((M_p, V_p), jnp.float32),
            grid_spec=pltpu.PrefetchScalarGridSpec(
                num_scalar_prefetch=0,
                grid=(M_p // TM, V_p // TN),
                in_specs=[
                    pl.BlockSpec((TM, H_p), lambda i, j: (i, 0)),
                    pl.BlockSpec((H_p, TN), lambda i, j: (0, j)),
                    pl.BlockSpec((1, TN), lambda i, j: (0, j)),
                ],
                out_specs=pl.BlockSpec((TM, TN), lambda i, j: (i, j)),
            ),
            compiler_params=_mosaic_params(("parallel", "parallel"),
                                           dense_bytes),
        )(y2d, wd_p, bd_p)
        logits_p = logits2d.reshape(T_p, B_p, V_p)

    output = logits_p[:T, :B, :V].reshape(T * B, V)
    new_state = hT_p[:B, :H][None, :, :]
    return output, new_state


def init_params(key, vocab_size, hidden_size):
    """Deterministic params matching nn.RNN(V, H) + nn.Linear(H, V) init bounds."""
    ks = jax.random.split(key, 6)
    stdv = 1.0 / math.sqrt(hidden_size)
    u = lambda k, shape, s: jax.random.uniform(k, shape, jnp.float32, -s, s)
    return {
        "w_ih": u(ks[0], (hidden_size, vocab_size), stdv),     # (H, V)
        "w_hh": u(ks[1], (hidden_size, hidden_size), stdv),    # (H, H)
        "b_ih": u(ks[2], (hidden_size,), stdv),
        "b_hh": u(ks[3], (hidden_size,), stdv),
        "w_dense": u(ks[4], (vocab_size, hidden_size), stdv),  # (V, H)
        "b_dense": u(ks[5], (vocab_size,), stdv),
    }


def _reference_forward(inputs, state, params, vocab_size):
    """Pure-JAX reference matching PyTorch nn.RNN(tanh) + Linear semantics."""
    B, T = inputs.shape
    x = jnp.transpose(jax.nn.one_hot(inputs, vocab_size, dtype=jnp.float32),
                      (1, 0, 2))                                # (T, B, V)
    h = state[0]
    ys = []
    for t in range(T):
        h = jnp.tanh(x[t] @ params["w_ih"].T + params["b_ih"]
                     + h @ params["w_hh"].T + params["b_hh"])
        ys.append(h)
    y = jnp.stack(ys)                                           # (T, B, H)
    out = y.reshape(T * B, -1) @ params["w_dense"].T + params["b_dense"]
    return out, h[None, :, :]


if __name__ == "__main__":
    B, T = 2, 8
    VOCAB = 16
    HIDDEN = 32

    key = jax.random.PRNGKey(0)
    k_params, k_tok, k_h0 = jax.random.split(key, 3)

    params = init_params(k_params, VOCAB, HIDDEN)
    inputs = jax.random.randint(k_tok, (B, T), 0, VOCAB, dtype=jnp.int32)
    state = jax.random.normal(k_h0, (1, B, HIDDEN), dtype=jnp.float32)

    ref_out, ref_state = _reference_forward(inputs, state, params, VOCAB)

    # Primary (fused) path: recurrence + dense epilogue in one kernel.
    output, new_state = rnn_model_forward(inputs, state, params, VOCAB)
    jax.block_until_ready((output, new_state))
    assert output.shape == (T * B, VOCAB)
    assert new_state.shape == (1, B, HIDDEN)
    assert jnp.allclose(output, ref_out, rtol=2e-2, atol=2e-2)
    assert jnp.allclose(new_state, ref_state, rtol=2e-2, atol=2e-2)

    # Large-vocab fallback path (bf16 y writeback + full-K dense matmul).
    out_u, st_u = rnn_model_forward(inputs, state, params, VOCAB,
                                    force_unfused=True)
    jax.block_until_ready((out_u, st_u))
    assert jnp.allclose(out_u, ref_out, rtol=2e-2, atol=2e-2)
    assert jnp.allclose(st_u, ref_state, rtol=2e-2, atol=2e-2)

    print("KERNEL_OK")
</pallas_src>

<mosaic_0001>
module attributes {stable_mosaic.version = 11 : i64} {
  func.func @rnn_fused_kernel(%arg0: i32, %arg1: memref<8x8x128xf32, #tpu.memory_space<vmem>>, %arg2: memref<128x128xbf16, #tpu.memory_space<vmem>>, %arg3: memref<8x128xf32, #tpu.memory_space<vmem>>, %arg4: memref<128x128xbf16, #tpu.memory_space<vmem>>, %arg5: memref<1x128xf32, #tpu.memory_space<vmem>>, %arg6: memref<8x8x128xf32, #tpu.memory_space<vmem>>, %arg7: memref<8x128xf32, #tpu.memory_space<vmem>>, %arg8: memref<8x128xf32, #tpu.memory_space<vmem>>, %arg9: memref<8x8x128xf32, #tpu.memory_space<vmem>>) attributes {dimension_semantics = [#tpu.dimension_semantics<arbitrary>], iteration_bounds = array<i64: 1>, scalar_prefetch = 0 : i64, scratch_operands = 2 : i64, tpu.core_type = #tpu.core_type<tc>, window_params = [{transform_indices = @transform_0, window_bounds = array<i64: 8, 8, 128>}, {pipeline_mode = #tpu.pipeline_mode<synchronous>, transform_indices = @transform_1, window_bounds = array<i64: 128, 128>}, {pipeline_mode = #tpu.pipeline_mode<synchronous>, transform_indices = @transform_2, window_bounds = array<i64: 8, 128>}, {pipeline_mode = #tpu.pipeline_mode<synchronous>, transform_indices = @transform_3, window_bounds = array<i64: 128, 128>}, {pipeline_mode = #tpu.pipeline_mode<synchronous>, transform_indices = @transform_4, window_bounds = array<i64: 1, 128>}, {transform_indices = @transform_5, window_bounds = array<i64: 8, 8, 128>}, {pipeline_mode = #tpu.pipeline_mode<synchronous>, transform_indices = @transform_6, window_bounds = array<i64: 8, 128>}]} {
    %c0_i32 = arith.constant 0 : i32
    %0 = arith.cmpi eq, %arg0, %c0_i32 : i32
    %1 = arith.extui %0 : i1 to i32
    %c0_i32_0 = arith.constant 0 : i32
    %2 = arith.cmpi ne, %1, %c0_i32_0 : i32
    scf.if %2 {
      %c0_89 = arith.constant 0 : index
      %c0_90 = arith.constant 0 : index
      %147 = vector.load %arg3[%c0_89, %c0_90] : memref<8x128xf32, #tpu.memory_space<vmem>>, vector<8x128xf32>
      %c0_91 = arith.constant 0 : index
      %c0_92 = arith.constant 0 : index
      %148 = vector.load %arg8[%c0_91, %c0_92] : memref<8x128xf32, #tpu.memory_space<vmem>>, vector<8x128xf32>
      tpu.vector_store %arg8[%c0_91, %c0_92], %147 {strides = array<i32>} : memref<8x128xf32, #tpu.memory_space<vmem>>, vector<8x128xf32>,
    } else {
    }
    %c0 = arith.constant 0 : index
    %c0_1 = arith.constant 0 : index
    %3 = vector.load %arg8[%c0, %c0_1] : memref<8x128xf32, #tpu.memory_space<vmem>>, vector<8x128xf32>
    %c0_i32_2 = arith.constant 0 : i32
    %4 = arith.index_cast %c0_i32_2 : i32 to index
    %c0_3 = arith.constant 0 : index
    %c0_4 = arith.constant 0 : index
    %5 = vector.load %arg1[%4, %c0_3, %c0_4] : memref<8x8x128xf32, #tpu.memory_space<vmem>>, vector<1x8x128xf32>
    %6 = vector.shape_cast %5 : vector<1x8x128xf32> to vector<8x128xf32>
    %7 = arith.truncf %3 : vector<8x128xf32> to vector<8x128xbf16>
    %c0_5 = arith.constant 0 : index
    %c0_6 = arith.constant 0 : index
    %8 = vector.load %arg2[%c0_5, %c0_6] : memref<128x128xbf16, #tpu.memory_space<vmem>>, vector<128x128xbf16>
    %cst = arith.constant dense<0.000000e+00> : vector<8x128xf32>
    %9 = tpu.matmul %7, %8, %cst {dimension_numbers = #tpu.dot_dimension_numbers<[1], [0], [0], [1], [0, 0, 1, 1], [], []>} : vector<8x128xbf16>, vector<128x128xbf16>, vector<8x128xf32> -> vector<8x128xf32>
    %10 = arith.addf %6, %9 : vector<8x128xf32>
    %11 = math.tanh %10 : vector<8x128xf32>
    %c8_i32 = arith.constant 8 : i32
    %12 = arith.muli %arg0, %c8_i32 : i32
    %13 = arith.addi %12, %c0_i32_2 : i32
    %c8_i32_7 = arith.constant 8 : i32
    %14 = arith.cmpi slt, %13, %c8_i32_7 : i32
    %15 = arith.select %14, %11, %3 : vector<8x128xf32>
    %16 = arith.index_cast %c0_i32_2 : i32 to index
    %c0_8 = arith.constant 0 : index
    %c0_9 = arith.constant 0 : index
    %17 = vector.load %arg9[%16, %c0_8, %c0_9] : memref<8x8x128xf32, #tpu.memory_space<vmem>>, vector<1x8x128xf32>
    %18 = vector.shape_cast %17 : vector<1x8x128xf32> to vector<8x128xf32>
    %19 = vector.shape_cast %15 : vector<8x128xf32> to vector<1x8x128xf32>
    tpu.vector_store %arg9[%16, %c0_8, %c0_9], %19 {strides = array<i32>} : memref<8x8x128xf32, #tpu.memory_space<vmem>>, vector<1x8x128xf32>,
    %c1_i32 = arith.constant 1 : i32
    %20 = arith.index_cast %c1_i32 : i32 to index
    %c0_10 = arith.constant 0 : index
    %c0_11 = arith.constant 0 : index
    %21 = vector.load %arg1[%20, %c0_10, %c0_11] : memref<8x8x128xf32, #tpu.memory_space<vmem>>, vector<1x8x128xf32>
    %22 = vector.shape_cast %21 : vector<1x8x128xf32> to vector<8x128xf32>
    %23 = arith.truncf %15 : vector<8x128xf32> to vector<8x128xbf16>
    %c0_12 = arith.constant 0 : index
    %c0_13 = arith.constant 0 : index
    %24 = vector.load %arg2[%c0_12, %c0_13] : memref<128x128xbf16, #tpu.memory_space<vmem>>, vector<128x128xbf16>
    %cst_14 = arith.constant dense<0.000000e+00> : vector<8x128xf32>
    %25 = tpu.matmul %23, %24, %cst_14 {dimension_numbers = #tpu.dot_dimension_numbers<[1], [0], [0], [1], [0, 0, 1, 1], [], []>} : vector<8x128xbf16>, vector<128x128xbf16>, vector<8x128xf32> -> vector<8x128xf32>
    %26 = arith.addf %22, %25 : vector<8x128xf32>
    %27 = math.tanh %26 : vector<8x128xf32>
    %c8_i32_15 = arith.constant 8 : i32
    %28 = arith.muli %arg0, %c8_i32_15 : i32
    %29 = arith.addi %28, %c1_i32 : i32
    %c8_i32_16 = arith.constant 8 : i32
    %30 = arith.cmpi slt, %29, %c8_i32_16 : i32
    %31 = arith.select %30, %27, %15 : vector<8x128xf32>
    %32 = arith.index_cast %c1_i32 : i32 to index
    %c0_17 = arith.constant 0 : index
    %c0_18 = arith.constant 0 : index
    %33 = vector.load %arg9[%32, %c0_17, %c0_18] : memref<8x8x128xf32, #tpu.memory_space<vmem>>, vector<1x8x128xf32>
    %34 = vector.shape_cast %33 : vector<1x8x128xf32> to vector<8x128xf32>
    %35 = vector.shape_cast %31 : vector<8x128xf32> to vector<1x8x128xf32>
    tpu.vector_store %arg9[%32, %c0_17, %c0_18], %35 {strides = array<i32>} : memref<8x8x128xf32, #tpu.memory_space<vmem>>, vector<1x8x128xf32>,
    %c2_i32 = arith.constant 2 : i32
    %36 = arith.index_cast %c2_i32 : i32 to index
    %c0_19 = arith.constant 0 : index
    %c0_20 = arith.constant 0 : index
    %37 = vector.load %arg1[%36, %c0_19, %c0_20] : memref<8x8x128xf32, #tpu.memory_space<vmem>>, vector<1x8x128xf32>
    %38 = vector.shape_cast %37 : vector<1x8x128xf32> to vector<8x128xf32>
    %39 = arith.truncf %31 : vector<8x128xf32> to vector<8x128xbf16>
    %c0_21 = arith.constant 0 : index
    %c0_22 = arith.constant 0 : index
    %40 = vector.load %arg2[%c0_21, %c0_22] : memref<128x128xbf16, #tpu.memory_space<vmem>>, vector<128x128xbf16>
    %cst_23 = arith.constant dense<0.000000e+00> : vector<8x128xf32>
    %41 = tpu.matmul %39, %40, %cst_23 {dimension_numbers = #tpu.dot_dimension_numbers<[1], [0], [0], [1], [0, 0, 1, 1], [], []>} : vector<8x128xbf16>, vector<128x128xbf16>, vector<8x128xf32> -> vector<8x128xf32>
    %42 = arith.addf %38, %41 : vector<8x128xf32>
    %43 = math.tanh %42 : vector<8x128xf32>
    %c8_i32_24 = arith.constant 8 : i32
    %44 = arith.muli %arg0, %c8_i32_24 : i32
    %45 = arith.addi %44, %c2_i32 : i32
    %c8_i32_25 = arith.constant 8 : i32
    %46 = arith.cmpi slt, %45, %c8_i32_25 : i32
    %47 = arith.select %46, %43, %31 : vector<8x128xf32>
    %48 = arith.index_cast %c2_i32 : i32 to index
    %c0_26 = arith.constant 0 : index
    %c0_27 = arith.constant 0 : index
    %49 = vector.load %arg9[%48, %c0_26, %c0_27] : memref<8x8x128xf32, #tpu.memory_space<vmem>>, vector<1x8x128xf32>
    %50 = vector.shape_cast %49 : vector<1x8x128xf32> to vector<8x128xf32>
    %51 = vector.shape_cast %47 : vector<8x128xf32> to vector<1x8x128xf32>
    tpu.vector_store %arg9[%48, %c0_26, %c0_27], %51 {strides = array<i32>} : memref<8x8x128xf32, #tpu.memory_space<vmem>>, vector<1x8x128xf32>,
    %c3_i32 = arith.constant 3 : i32
    %52 = arith.index_cast %c3_i32 : i32 to index
    %c0_28 = arith.constant 0 : index
    %c0_29 = arith.constant 0 : index
    %53 = vector.load %arg1[%52, %c0_28, %c0_29] : memref<8x8x128xf32, #tpu.memory_space<vmem>>, vector<1x8x128xf32>
    %54 = vector.shape_cast %53 : vector<1x8x128xf32> to vector<8x128xf32>
    %55 = arith.truncf %47 : vector<8x128xf32> to vector<8x128xbf16>
    %c0_30 = arith.constant 0 : index
    %c0_31 = arith.constant 0 : index
    %56 = vector.load %arg2[%c0_30, %c0_31] : memref<128x128xbf16, #tpu.memory_space<vmem>>, vector<128x128xbf16>
    %cst_32 = arith.constant dense<0.000000e+00> : vector<8x128xf32>
    %57 = tpu.matmul %55, %56, %cst_32 {dimension_numbers = #tpu.dot_dimension_numbers<[1], [0], [0], [1], [0, 0, 1, 1], [], []>} : vector<8x128xbf16>, vector<128x128xbf16>, vector<8x128xf32> -> vector<8x128xf32>
    %58 = arith.addf %54, %57 : vector<8x128xf32>
    %59 = math.tanh %58 : vector<8x128xf32>
    %c8_i32_33 = arith.constant 8 : i32
    %60 = arith.muli %arg0, %c8_i32_33 : i32
    %61 = arith.addi %60, %c3_i32 : i32
    %c8_i32_34 = arith.constant 8 : i32
    %62 = arith.cmpi slt, %61, %c8_i32_34 : i32
    %63 = arith.select %62, %59, %47 : vector<8x128xf32>
    %64 = arith.index_cast %c3_i32 : i32 to index
    %c0_35 = arith.constant 0 : index
    %c0_36 = arith.constant 0 : index
    %65 = vector.load %arg9[%64, %c0_35, %c0_36] : memref<8x8x128xf32, #tpu.memory_space<vmem>>, vector<1x8x128xf32>
    %66 = vector.shape_cast %65 : vector<1x8x128xf32> to vector<8x128xf32>
    %67 = vector.shape_cast %63 : vector<8x128xf32> to vector<1x8x128xf32>
    tpu.vector_store %arg9[%64, %c0_35, %c0_36], %67 {strides = array<i32>} : memref<8x8x128xf32, #tpu.memory_space<vmem>>, vector<1x8x128xf32>,
    %c4_i32 = arith.constant 4 : i32
    %68 = arith.index_cast %c4_i32 : i32 to index
    %c0_37 = arith.constant 0 : index
    %c0_38 = arith.constant 0 : index
    %69 = vector.load %arg1[%68, %c0_37, %c0_38] : memref<8x8x128xf32, #tpu.memory_space<vmem>>, vector<1x8x128xf32>
    %70 = vector.shape_cast %69 : vector<1x8x128xf32> to vector<8x128xf32>
    %71 = arith.truncf %63 : vector<8x128xf32> to vector<8x128xbf16>
    %c0_39 = arith.constant 0 : index
    %c0_40 = arith.constant 0 : index
    %72 = vector.load %arg2[%c0_39, %c0_40] : memref<128x128xbf16, #tpu.memory_space<vmem>>, vector<128x128xbf16>
    %cst_41 = arith.constant dense<0.000000e+00> : vector<8x128xf32>
    %73 = tpu.matmul %71, %72, %cst_41 {dimension_numbers = #tpu.dot_dimension_numbers<[1], [0], [0], [1], [0, 0, 1, 1], [], []>} : vector<8x128xbf16>, vector<128x128xbf16>, vector<8x128xf32> -> vector<8x128xf32>
    %74 = arith.addf %70, %73 : vector<8x128xf32>
    %75 = math.tanh %74 : vector<8x128xf32>
    %c8_i32_42 = arith.constant 8 : i32
    %76 = arith.muli %arg0, %c8_i32_42 : i32
    %77 = arith.addi %76, %c4_i32 : i32
    %c8_i32_43 = arith.constant 8 : i32
    %78 = arith.cmpi slt, %77, %c8_i32_43 : i32
    %79 = arith.select %78, %75, %63 : vector<8x128xf32>
    %80 = arith.index_cast %c4_i32 : i32 to index
    %c0_44 = arith.constant 0 : index
    %c0_45 = arith.constant 0 : index
    %81 = vector.load %arg9[%80, %c0_44, %c0_45] : memref<8x8x128xf32, #tpu.memory_space<vmem>>, vector<1x8x128xf32>
    %82 = vector.shape_cast %81 : vector<1x8x128xf32> to vector<8x128xf32>
    %83 = vector.shape_cast %79 : vector<8x128xf32> to vector<1x8x128xf32>
    tpu.vector_store %arg9[%80, %c0_44, %c0_45], %83 {strides = array<i32>} : memref<8x8x128xf32, #tpu.memory_space<vmem>>, vector<1x8x128xf32>,
    %c5_i32 = arith.constant 5 : i32
    %84 = arith.index_cast %c5_i32 : i32 to index
    %c0_46 = arith.constant 0 : index
    %c0_47 = arith.constant 0 : index
    %85 = vector.load %arg1[%84, %c0_46, %c0_47] : memref<8x8x128xf32, #tpu.memory_space<vmem>>, vector<1x8x128xf32>
    %86 = vector.shape_cast %85 : vector<1x8x128xf32> to vector<8x128xf32>
    %87 = arith.truncf %79 : vector<8x128xf32> to vector<8x128xbf16>
    %c0_48 = arith.constant 0 : index
    %c0_49 = arith.constant 0 : index
    %88 = vector.load %arg2[%c0_48, %c0_49] : memref<128x128xbf16, #tpu.memory_space<vmem>>, vector<128x128xbf16>
    %cst_50 = arith.constant dense<0.000000e+00> : vector<8x128xf32>
    %89 = tpu.matmul %87, %88, %cst_50 {dimension_numbers = #tpu.dot_dimension_numbers<[1], [0], [0], [1], [0, 0, 1, 1], [], []>} : vector<8x128xbf16>, vector<128x128xbf16>, vector<8x128xf32> -> vector<8x128xf32>
    %90 = arith.addf %86, %89 : vector<8x128xf32>
    %91 = math.tanh %90 : vector<8x128xf32>
    %c8_i32_51 = arith.constant 8 : i32
    %92 = arith.muli %arg0, %c8_i32_51 : i32
    %93 = arith.addi %92, %c5_i32 : i32
    %c8_i32_52 = arith.constant 8 : i32
    %94 = arith.cmpi slt, %93, %c8_i32_52 : i32
    %95 = arith.select %94, %91, %79 : vector<8x128xf32>
    %96 = arith.index_cast %c5_i32 : i32 to index
    %c0_53 = arith.constant 0 : index
    %c0_54 = arith.constant 0 : index
    %97 = vector.load %arg9[%96, %c0_53, %c0_54] : memref<8x8x128xf32, #tpu.memory_space<vmem>>, vector<1x8x128xf32>
    %98 = vector.shape_cast %97 : vector<1x8x128xf32> to vector<8x128xf32>
    %99 = vector.shape_cast %95 : vector<8x128xf32> to vector<1x8x128xf32>
    tpu.vector_store %arg9[%96, %c0_53, %c0_54], %99 {strides = array<i32>} : memref<8x8x128xf32, #tpu.memory_space<vmem>>, vector<1x8x128xf32>,
    %c6_i32 = arith.constant 6 : i32
    %100 = arith.index_cast %c6_i32 : i32 to index
    %c0_55 = arith.constant 0 : index
    %c0_56 = arith.constant 0 : index
    %101 = vector.load %arg1[%100, %c0_55, %c0_56] : memref<8x8x128xf32, #tpu.memory_space<vmem>>, vector<1x8x128xf32>
    %102 = vector.shape_cast %101 : vector<1x8x128xf32> to vector<8x128xf32>
    %103 = arith.truncf %95 : vector<8x128xf32> to vector<8x128xbf16>
    %c0_57 = arith.constant 0 : index
    %c0_58 = arith.constant 0 : index
    %104 = vector.load %arg2[%c0_57, %c0_58] : memref<128x128xbf16, #tpu.memory_space<vmem>>, vector<128x128xbf16>
    %cst_59 = arith.constant dense<0.000000e+00> : vector<8x128xf32>
    %105 = tpu.matmul %103, %104, %cst_59 {dimension_numbers = #tpu.dot_dimension_numbers<[1], [0], [0], [1], [0, 0, 1, 1], [], []>} : vector<8x128xbf16>, vector<128x128xbf16>, vector<8x128xf32> -> vector<8x128xf32>
    %106 = arith.addf %102, %105 : vector<8x128xf32>
    %107 = math.tanh %106 : vector<8x128xf32>
    %c8_i32_60 = arith.constant 8 : i32
    %108 = arith.muli %arg0, %c8_i32_60 : i32
    %109 = arith.addi %108, %c6_i32 : i32
    %c8_i32_61 = arith.constant 8 : i32
    %110 = arith.cmpi slt, %109, %c8_i32_61 : i32
    %111 = arith.select %110, %107, %95 : vector<8x128xf32>
    %112 = arith.index_cast %c6_i32 : i32 to index
    %c0_62 = arith.constant 0 : index
    %c0_63 = arith.constant 0 : index
    %113 = vector.load %arg9[%112, %c0_62, %c0_63] : memref<8x8x128xf32, #tpu.memory_space<vmem>>, vector<1x8x128xf32>
    %114 = vector.shape_cast %113 : vector<1x8x128xf32> to vector<8x128xf32>
    %115 = vector.shape_cast %111 : vector<8x128xf32> to vector<1x8x128xf32>
    tpu.vector_store %arg9[%112, %c0_62, %c0_63], %115 {strides = array<i32>} : memref<8x8x128xf32, #tpu.memory_space<vmem>>, vector<1x8x128xf32>,
    %c7_i32 = arith.constant 7 : i32
    %116 = arith.index_cast %c7_i32 : i32 to index
    %c0_64 = arith.constant 0 : index
    %c0_65 = arith.constant 0 : index
    %117 = vector.load %arg1[%116, %c0_64, %c0_65] : memref<8x8x128xf32, #tpu.memory_space<vmem>>, vector<1x8x128xf32>
    %118 = vector.shape_cast %117 : vector<1x8x128xf32> to vector<8x128xf32>
    %119 = arith.truncf %111 : vector<8x128xf32> to vector<8x128xbf16>
    %c0_66 = arith.constant 0 : index
    %c0_67 = arith.constant 0 : index
    %120 = vector.load %arg2[%c0_66, %c0_67] : memref<128x128xbf16, #tpu.memory_space<vmem>>, vector<128x128xbf16>
    %cst_68 = arith.constant dense<0.000000e+00> : vector<8x128xf32>
    %121 = tpu.matmul %119, %120, %cst_68 {dimension_numbers = #tpu.dot_dimension_numbers<[1], [0], [0], [1], [0, 0, 1, 1], [], []>} : vector<8x128xbf16>, vector<128x128xbf16>, vector<8x128xf32> -> vector<8x128xf32>
    %122 = arith.addf %118, %121 : vector<8x128xf32>
    %123 = math.tanh %122 : vector<8x128xf32>
    %c8_i32_69 = arith.constant 8 : i32
    %124 = arith.muli %arg0, %c8_i32_69 : i32
    %125 = arith.addi %124, %c7_i32 : i32
    %c8_i32_70 = arith.constant 8 : i32
    %126 = arith.cmpi slt, %125, %c8_i32_70 : i32
    %127 = arith.select %126, %123, %111 : vector<8x128xf32>
    %128 = arith.index_cast %c7_i32 : i32 to index
    %c0_71 = arith.constant 0 : index
    %c0_72 = arith.constant 0 : index
    %129 = vector.load %arg9[%128, %c0_71, %c0_72] : memref<8x8x128xf32, #tpu.memory_space<vmem>>, vector<1x8x128xf32>
    %130 = vector.shape_cast %129 : vector<1x8x128xf32> to vector<8x128xf32>
    %131 = vector.shape_cast %127 : vector<8x128xf32> to vector<1x8x128xf32>
    tpu.vector_store %arg9[%128, %c0_71, %c0_72], %131 {strides = array<i32>} : memref<8x8x128xf32, #tpu.memory_space<vmem>>, vector<1x8x128xf32>,
    %c8_i32_73 = arith.constant 8 : i32
    %c0_74 = arith.constant 0 : index
    %c0_75 = arith.constant 0 : index
    %132 = vector.load %arg8[%c0_74, %c0_75] : memref<8x128xf32, #tpu.memory_space<vmem>>, vector<8x128xf32>
    tpu.vector_store %arg8[%c0_74, %c0_75], %127 {strides = array<i32>} : memref<8x128xf32, #tpu.memory_space<vmem>>, vector<8x128xf32>,
    %c0_76 = arith.constant 0 : index
    %c0_77 = arith.constant 0 : index
    %c0_78 = arith.constant 0 : index
    %133 = vector.load %arg9[%c0_76, %c0_77, %c0_78] : memref<8x8x128xf32, #tpu.memory_space<vmem>>, vector<8x8x128xf32>
    %134 = vector.shape_cast %133 : vector<8x8x128xf32> to vector<64x128xf32>
    %135 = arith.truncf %134 : vector<64x128xf32> to vector<64x128xbf16>
    %c0_79 = arith.constant 0 : index
    %c0_80 = arith.constant 0 : index
    %136 = vector.load %arg4[%c0_79, %c0_80] : memref<128x128xbf16, #tpu.memory_space<vmem>>, vector<128x128xbf16>
    %cst_81 = arith.constant dense<0.000000e+00> : vector<64x128xf32>
    %137 = tpu.matmul %135, %136, %cst_81 {dimension_numbers = #tpu.dot_dimension_numbers<[1], [0], [0], [1], [0, 0, 1, 1], [], []>} : vector<64x128xbf16>, vector<128x128xbf16>, vector<64x128xf32> -> vector<64x128xf32>
    %138 = vector.shape_cast %137 : vector<64x128xf32> to vector<8x8x128xf32>
    %c0_82 = arith.constant 0 : index
    %c0_83 = arith.constant 0 : index
    %139 = vector.load %arg5[%c0_82, %c0_83] : memref<1x128xf32, #tpu.memory_space<vmem>>, vector<1x128xf32>
    %140 = vector.shape_cast %139 : vector<1x128xf32> to vector<1x1x128xf32>
    %141 = vector.broadcast %140 : vector<1x1x128xf32> to vector<8x8x128xf32>
    %142 = arith.addf %138, %141 : vector<8x8x128xf32>
    %c0_84 = arith.constant 0 : index
    %c0_85 = arith.constant 0 : index
    %c0_86 = arith.constant 0 : index
    %143 = vector.load %arg6[%c0_84, %c0_85, %c0_86] : memref<8x8x128xf32, #tpu.memory_space<vmem>>, vector<8x8x128xf32>
    tpu.vector_store %arg6[%c0_84, %c0_85, %c0_86], %142 {strides = array<i32>} : memref<8x8x128xf32, #tpu.memory_space<vmem>>, vector<8x8x128xf32>,
    %c0_i32_87 = arith.constant 0 : i32
    %144 = arith.cmpi eq, %arg0, %c0_i32_87 : i32
    %145 = arith.extui %144 : i1 to i32
    %c0_i32_88 = arith.constant 0 : i32
    %146 = arith.cmpi ne, %145, %c0_i32_88 : i32
    scf.if %146 {
      %c0_89 = arith.constant 0 : index
      %c0_90 = arith.constant 0 : index
      %147 = vector.load %arg8[%c0_89, %c0_90] : memref<8x128xf32, #tpu.memory_space<vmem>>, vector<8x128xf32>
      %c0_91 = arith.constant 0 : index
      %c0_92 = arith.constant 0 : index
      %148 = vector.load %arg7[%c0_91, %c0_92] : memref<8x128xf32, #tpu.memory_space<vmem>>, vector<8x128xf32>
      tpu.vector_store %arg7[%c0_91, %c0_92], %147 {strides = array<i32>} : memref<8x128xf32, #tpu.memory_space<vmem>>, vector<8x128xf32>,
    } else {
    }
    return
  }
  func.func @transform_0(%arg0: i32) -> (i32, i32, i32) {
    %c0_i32 = arith.constant 0 : i32
    %c0_i32_0 = arith.constant 0 : i32
    %c0_i32_1 = arith.constant 0 : i32
    return %arg0, %c0_i32, %c0_i32_0 : i32, i32, i32
  }
  func.func @transform_1(%arg0: i32) -> (i32, i32) {
    %c0_i32 = arith.constant 0 : i32
    %c0_i32_0 = arith.constant 0 : i32
    %c0_i32_1 = arith.constant 0 : i32
    return %c0_i32, %c0_i32_0 : i32, i32
  }
  func.func @transform_2(%arg0: i32) -> (i32, i32) {
    %c0_i32 = arith.constant 0 : i32
    %c0_i32_0 = arith.constant 0 : i32
    %c0_i32_1 = arith.constant 0 : i32
    return %c0_i32, %c0_i32_0 : i32, i32
  }
  func.func @transform_3(%arg0: i32) -> (i32, i32) {
    %c0_i32 = arith.constant 0 : i32
    %c0_i32_0 = arith.constant 0 : i32
    %c0_i32_1 = arith.constant 0 : i32
    return %c0_i32, %c0_i32_0 : i32, i32
  }
  func.func @transform_4(%arg0: i32) -> (i32, i32) {
    %c0_i32 = arith.constant 0 : i32
    %c0_i32_0 = arith.constant 0 : i32
    %c0_i32_1 = arith.constant 0 : i32
    return %c0_i32, %c0_i32_0 : i32, i32
  }
  func.func @transform_5(%arg0: i32) -> (i32, i32, i32) {
    %c0_i32 = arith.constant 0 : i32
    %c0_i32_0 = arith.constant 0 : i32
    %c0_i32_1 = arith.constant 0 : i32
    return %arg0, %c0_i32, %c0_i32_0 : i32, i32, i32
  }
  func.func @transform_6(%arg0: i32) -> (i32, i32) {
    %c0_i32 = arith.constant 0 : i32
    %c0_i32_0 = arith.constant 0 : i32
    %c0_i32_1 = arith.constant 0 : i32
    return %c0_i32, %c0_i32_0 : i32, i32
  }
}

</mosaic_0001>

<bundles_post_ra>
// kernel: tpu_custom_call.1
= control target key start
LH: loop header
LB: loop body
LE: loop exit
PB: predicated region body
PF: predicated region fallthrough
CT: control target
= control target key end

     0   :  { %12 = vsyncpa [#allocation5], 0  ;;  %s2051_s0 = inlined_call_operand.hbm [shape: f32[8,8,128], index: 0, kind: input, shape index: {}]   ;;  %s2052_s1 = inlined_call_operand.hbm [shape: bf16[128,128], index: 1, kind: input, shape index: {}]   ;;  %s2053_s2 = inlined_call_operand.hbm [shape: f32[8,128], index: 2, kind: input, shape index: {}]   ;;  %s2054_s3 = inlined_call_operand.hbm [shape: bf16[128,128], index: 3, kind: input, shape index: {}]   ;;  %s2055_s4 = inlined_call_operand.vmem [shape: f32[1,128], index: 4, kind: input, shape index: {}]   ;;  %s2056_s5 = inlined_call_operand.hbm [shape: f32[8,8,128], index: 5, kind: output, shape index: {0}]   ;;  %s2057_s6 = inlined_call_operand.hbm [shape: f32[8,128], index: 6, kind: output, shape index: {1}]  }
   0x1   :  { %13 = vsyncpa [#allocation8], 0 }
   0x2   :  { %14 = vsyncpa [#allocation11], 0 }
   0x3   :  { %15 = vsyncpa [#allocation6], 0 }
   0x4   :  { %16 = vsyncpa [#allocation14], 0  ;;  %s1805_s21 = smov [#allocation7]   ;;  %s1663_s25 = scalar_lea.hbm %s2052_s1, 1024 }
   0x5   :  { %s34_s22 = sshll.u32 %s1805_s21, 4  ;;  %p1664_p0 = scmp.ne.s32.totalorder %s2052_s1, %s1663_s25  ;;  %s35_s22 = int_to_ptr.vmem [resolvable:$true] %s34_s22 }
   0x6   :  { %p1667_p1 = scmp.lt.u32.totalorder %s1663_s25, %s2052_s1 }
   0x8   :  { %p1669_p2 = pnand %p1667_p1, %p1664_p0 }
   0xa   :  { %1672 = shalt.err (!%p1669_p2)
}
   0xb   :  { %s1673_s30 = scalar_lea.vmem %s35_s22, 1024  ;;  %p1678_p4 = scmp.lt.s32.totalorder %s35_s22, %s35_s22 }
   0xc   :  { %p1674_p3 = scmp.ne.s32.totalorder %s35_s22, %s1673_s30  ;;  %p1679_p5 = scmp.lt.s32.totalorder %s1673_s30, %s1673_s30 }
   0xe   :  { %p1680_p6 = por %p1679_p5, %p1678_p4 }
  0x10   :  { %p1681_p7 = pnand %p1680_p6, %p1674_p3 }
  0x12   :  { %1684 = shalt.err (!%p1681_p7)
}
  0x13   :  { %s1806_s7 = smov 64   ;;  %s1807_s8 = smov 4  }
  0x14   :  { %40 = dma.hbm_to_vmem [thread:$0]  %s2052_s1, 1024, %s35_s22, [#allocation8], %s1806_s7, %s1806_s7, %s1807_s8  }
  0x15   :  { %s1808_s11 = smov [#allocation4]   ;;  %s1685_s15 = scalar_lea.hbm %s2051_s0, 1024 }
  0x16   :  { %s22_s12 = sshll.u32 %s1808_s11, 4  ;;  %p1686_p8 = scmp.ne.s32.totalorder %s2051_s0, %s1685_s15  ;;  %s23_s12 = int_to_ptr.vmem [resolvable:$true] %s22_s12 }
  0x17   :  { %p1689_p9 = scmp.lt.u32.totalorder %s1685_s15, %s2051_s0 }
  0x19   :  { %p1691_p10 = pnand %p1689_p9, %p1686_p8 }
  0x1b   :  { %1694 = shalt.err (!%p1691_p10)
}
  0x1c   :  { %s1695_s20 = scalar_lea.vmem %s23_s12, 1024  ;;  %p1700_p12 = scmp.lt.s32.totalorder %s23_s12, %s23_s12 }
  0x1d   :  { %p1696_p11 = scmp.ne.s32.totalorder %s23_s12, %s1695_s20  ;;  %p1701_p13 = scmp.lt.s32.totalorder %s1695_s20, %s1695_s20 }
  0x1f   :  { %p1702_p0 = por %p1701_p13, %p1700_p12 }
  0x21   :  { %p1703_p1 = pnand %p1702_p0, %p1696_p11 }
  0x23   :  { %1706 = shalt.err (!%p1703_p1)
}
  0x24   :  { %s1809_s1 = smov 128   ;;  %s1810_s21 = smov 8  }
  0x25   :  { %28 = dma.hbm_to_vmem [thread:$0]  %s2051_s0, 1024, %s23_s12, [#allocation5], %s1809_s1, %s1809_s1, %s1810_s21  }
  0x26   :  { %s1811_s24 = smov [#allocation9]   ;;  %s1812_s26 = smov [#allocation10]  }
  0x27   :  { %s47_s25 = sshll.u32 %s1811_s24, 4  ;;  %s56_s27 = sshll.u32 %s1812_s26, 4  ;;  %s48_s25 = int_to_ptr.vmem [resolvable:$true] %s47_s25  ;;  %s1882_s27 = int_to_ptr.vmem [resolvable:$true] %s56_s27 }
  0x28   :  { %s1707_s30 = scalar_lea.hbm %s2053_s2, 128 }
  0x29   :  { %p1708_p2 = scmp.ne.s32.totalorder %s2053_s2, %s1707_s30  ;;  %p1711_p3 = scmp.lt.u32.totalorder %s1707_s30, %s2053_s2 }
  0x2b   :  { %p1713_p4 = pnand %p1711_p3, %p1708_p2 }
  0x2d   :  { %1716 = shalt.err (!%p1713_p4)
}
  0x2e   :  { %s1717_s0 = scalar_lea.vmem %s48_s25, 128  ;;  %p1722_p6 = scmp.lt.s32.totalorder %s48_s25, %s48_s25 }
  0x2f   :  { %p1718_p5 = scmp.ne.s32.totalorder %s48_s25, %s1717_s0  ;;  %p1723_p7 = scmp.lt.s32.totalorder %s1717_s0, %s1717_s0 }
  0x31   :  { %p1724_p8 = por %p1723_p7, %p1722_p6 }
  0x33   :  { %p1725_p9 = pnand %p1724_p8, %p1718_p5 }
  0x35   :  { %1728 = shalt.err (!%p1725_p9)
}
  0x36   :  { %50 = dma.hbm_to_vmem [thread:$0]  %s2053_s2, 128, %s48_s25, [#allocation8]  }
  0x37   :  { %s1729_s17 = scalar_lea.hbm %s2054_s3, 1024 }
  0x38   :  { %p1730_p10 = scmp.ne.s32.totalorder %s2054_s3, %s1729_s17  ;;  %p1733_p11 = scmp.lt.u32.totalorder %s1729_s17, %s2054_s3 }
  0x3a   :  { %p1735_p12 = pnand %p1733_p11, %p1730_p10 }
  0x3c   :  { %1738 = shalt.err (!%p1735_p12)
}
  0x3d   :  { %s1739_s23 = scalar_lea.vmem %s1882_s27, 1024  ;;  %p1744_p0 = scmp.lt.s32.totalorder %s1882_s27, %s1882_s27 }
  0x3e   :  { %p1740_p13 = scmp.ne.s32.totalorder %s1882_s27, %s1739_s23  ;;  %p1745_p1 = scmp.lt.s32.totalorder %s1739_s23, %s1739_s23 }
  0x40   :  { %p1746_p2 = por %p1745_p1, %p1744_p0 }
  0x42   :  { %p1747_p3 = pnand %p1746_p2, %p1740_p13 }
  0x44   :  { %1750 = shalt.err (!%p1747_p3)
}
  0x45   :  { %62 = dma.hbm_to_vmem [thread:$0]  %s2054_s3, 1024, %s1882_s27, [#allocation11], %s1806_s7, %s1806_s7, %s1807_s8  }
  0x46   :  { %1795 = dma.done.wait [#allocation5], 1024  }
  0x47   :  { %1796 = vsyncadd [#allocation5], 4294966272 }
  0x48   :  { %1797 = dma.done.wait [#allocation8], 1152  }
  0x49   :  { %1798 = vsyncadd [#allocation8], 4294966144 }
  0x4a   :  { %1799 = dma.done.wait [#allocation11], 1024  }
  0x4b   :  { %1800 = vsyncadd [#allocation11], 4294966272  ;;  %v1813_v0 = vmov 0.0   ;;  %vm1814_vm0 = vmmov 0   ;;  %v1575_v1 = vld [vmem:[#allocation7] sm:$0xff]   ;;  %v1576_v2 = vld [vmem:[#allocation7 + $0x8] sm:$0xff]  }
  0x4c   :  { %1379 = vmatprep.subr.bf16.mxu1 %v1813_v0  ;;  %1395 = vmatprep.mubr.msk.bf16.mxu1 %vm1814_vm0, %v1813_v0  ;;  %v1577_v3 = vld [vmem:[#allocation7 + $0x10] sm:$0xff]   ;;  %v1578_v4 = vld [vmem:[#allocation7 + $0x18] sm:$0xff]   ;;  %v1579_v5 = vld [vmem:[#allocation7 + $0x20] sm:$0xff]  }
  0x4d   :  { %1419 = vmatprep.subr.bf16.mxu0 %v1813_v0  ;;  %1435 = vmatprep.mubr.msk.bf16.mxu0 %vm1814_vm0, %v1813_v0  ;;  %v1580_v6 = vld [vmem:[#allocation7 + $0x28] sm:$0xff]   ;;  %v1581_v7 = vld [vmem:[#allocation7 + $0x30] sm:$0xff]   ;;  %v1582_v8 = vld [vmem:[#allocation7 + $0x38] sm:$0xff]  }
  0x4e   :  { %1380 = vmatpush3.bf16.msra.mxu1 %v1575_v1  ;;  %v82_v9 = vld [vmem:[#allocation9] sm:$0xff]  ;;  %v1584_v12 = vld [vmem:[#allocation7 + $0x8] sm:$0xff]   ;;  %v1585_v13 = vld [vmem:[#allocation7 + $0x10] sm:$0xff]  }
  0x4f   :  { %1381 = vmatprep.subr.bf16.mxu1 %v1813_v0  ;;  %v1583_v10 = vld [vmem:[#allocation7] sm:$0xff]   ;;  %v86_v11 = vpack.c.bf16 %v82_v9, %v82_v9  ;;  %v1586_v14 = vld [vmem:[#allocation7 + $0x18] sm:$0xff]   ;;  %v1588_v16 = vld [vmem:[#allocation7 + $0x28] sm:$0xff]  }
  0x50   :  { %v1587_v15 = vld [vmem:[#allocation7 + $0x20] sm:$0xff]   ;;  %v1589_v17 = vld [vmem:[#allocation7 + $0x30] sm:$0xff]   ;;  %v1590_v18 = vld [vmem:[#allocation7 + $0x38] sm:$0xff]  }
  0x51   :  { %v1591_v19 = vld [vmem:[#allocation7] sm:$0xff]   ;;  %v1592_v20 = vld [vmem:[#allocation7 + $0x8] sm:$0xff]   ;;  %v1593_v21 = vld [vmem:[#allocation7 + $0x10] sm:$0xff]  }
  0x52   :  { %1382 = vmatpush3.bf16.msra.mxu1 %v1576_v2  ;;  %1420 = vmatpush3.bf16.msra.mxu0 %v1591_v19  ;;  %v1594_v22 = vld [vmem:[#allocation7 + $0x18] sm:$0xff]   ;;  %v85_v23 = vld [vmem:[#allocation4] sm:$0xff]  ;;  %v1596_v32 = vld [vmem:[#allocation7 + $0x28] sm:$0xff]  }
  0x53   :  { %1383 = vmatprep.subr.bf16.mxu1 %v1813_v0  ;;  %1421 = vmatprep.subr.bf16.mxu0 %v1813_v0  ;;  %v1595_v31 = vld [vmem:[#allocation7 + $0x20] sm:$0xff]   ;;  %v1597_v33 = vld [vmem:[#allocation7 + $0x30] sm:$0xff]   ;;  %v1598_v34 = vld [vmem:[#allocation7 + $0x38] sm:$0xff]  }
  0x54   :  { %v1599_v35 = vld [vmem:[#allocation7] sm:$0xff]   ;;  %v1600_v36 = vld [vmem:[#allocation7 + $0x8] sm:$0xff]   ;;  %v1601_v37 = vld [vmem:[#allocation7 + $0x10] sm:$0xff]  }
  0x55   :  { %v1602_v38 = vld [vmem:[#allocation7 + $0x18] sm:$0xff]   ;;  %v201_v39 = vld [vmem:[#allocation4 + $0x8] sm:$0xff]  ;;  %v1603_v47 = vld [vmem:[#allocation7 + $0x20] sm:$0xff]  }
  0x56   :  { %1384 = vmatpush3.bf16.msra.mxu1 %v1577_v3  ;;  %1422 = vmatpush3.bf16.msra.mxu0 %v1592_v20  ;;  %v1604_v48 = vld [vmem:[#allocation7 + $0x28] sm:$0xff]   ;;  %v1605_v49 = vld [vmem:[#allocation7 + $0x30] sm:$0xff]   ;;  %v1606_v50 = vld [vmem:[#allocation7 + $0x38] sm:$0xff]  }
  0x57   :  { %1385 = vmatprep.subr.bf16.mxu1 %v1813_v0  ;;  %1423 = vmatprep.subr.bf16.mxu0 %v1813_v0  ;;  %v1607_v51 = vld [vmem:[#allocation7] sm:$0xff]   ;;  %v1608_v52 = vld [vmem:[#allocation7 + $0x8] sm:$0xff]   ;;  %v1609_v53 = vld [vmem:[#allocation7 + $0x10] sm:$0xff]  }
  0x58   :  { %v1610_v54 = vld [vmem:[#allocation7 + $0x18] sm:$0xff]   ;;  %v318_v55 = vld [vmem:[#allocation4 + $0x10] sm:$0xff]  ;;  %v1611_v63 = vld [vmem:[#allocation7 + $0x20] sm:$0xff]  }
  0x59   :  { %v1612_v1 = vld [vmem:[#allocation7 + $0x28] sm:$0xff]   ;;  %v1613_v2 = vld [vmem:[#allocation7 + $0x30] sm:$0xff]   ;;  %v1614_v3 = vld [vmem:[#allocation7 + $0x38] sm:$0xff]  }
  0x5a   :  { %1386 = vmatpush3.bf16.msra.mxu1 %v1578_v4  ;;  %1424 = vmatpush3.bf16.msra.mxu0 %v1593_v21  ;;  %v1615_v4 = vld [vmem:[#allocation7] sm:$0xff]   ;;  %v1622_v19 = vld [vmem:[#allocation7 + $0x38] sm:$0xff]   ;;  %v1624_v21 = vld [vmem:[#allocation7 + $0x8] sm:$0xff]  }
  0x5b   :  { %1387 = vmatprep.subr.bf16.mxu1 %v1813_v0  ;;  %1425 = vmatprep.subr.bf16.mxu0 %v1813_v0  ;;  %v1623_v20 = vld [vmem:[#allocation7] sm:$0xff]  }
  0x5e   :  { %1388 = vmatpush3.bf16.msra.mxu1 %v1579_v5  ;;  %1426 = vmatpush3.bf16.msra.mxu0 %v1594_v22  ;;  %v1616_v5 = vld [vmem:[#allocation7 + $0x8] sm:$0xff]   ;;  %v1625_v22 = vld [vmem:[#allocation7 + $0x10] sm:$0xff]  }
  0x5f   :  { %1389 = vmatprep.subr.bf16.mxu1 %v1813_v0  ;;  %1427 = vmatprep.subr.bf16.mxu0 %v1813_v0 }
  0x62   :  { %1390 = vmatpush3.bf16.msra.mxu1 %v1580_v6  ;;  %1428 = vmatpush3.bf16.msra.mxu0 %v1595_v31  ;;  %v1617_v6 = vld [vmem:[#allocation7 + $0x10] sm:$0xff]  }
  0x63   :  { %1391 = vmatprep.subr.bf16.mxu1 %v1813_v0  ;;  %1429 = vmatprep.subr.bf16.mxu0 %v1813_v0 }
  0x66   :  { %1392 = vmatpush3.bf16.msra.mxu1 %v1581_v7  ;;  %1430 = vmatpush3.bf16.msra.mxu0 %v1596_v32  ;;  %v1618_v7 = vld [vmem:[#allocation7 + $0x18] sm:$0xff]  }
  0x67   :  { %1393 = vmatprep.subr.bf16.mxu1 %v1813_v0  ;;  %1431 = vmatprep.subr.bf16.mxu0 %v1813_v0 }
  0x6a   :  { %1394 = vmatpush3.bf16.msra.mxu1 %v1582_v8  ;;  %1432 = vmatpush3.bf16.msra.mxu0 %v1597_v33  ;;  %v435_v8 = vld [vmem:[#allocation4 + $0x18] sm:$0xff]  ;;  %v1627_v33 = vld [vmem:[#allocation7 + $0x20] sm:$0xff]  }
  0x6b   :  { %1399 = vmatprep.subr.bf16.mxu1 %v1813_v0  ;;  %1433 = vmatprep.subr.bf16.mxu0 %v1813_v0 }
  0x6d   :  { %1396 = vmatmul.mubr.bf16.vlgmr.msra.gmra.mrb[0].mxu1 %v86_v11 }
  0x6e   :  { %1400 = vmatpush3.bf16.msra.mxu1 %v1583_v10  ;;  %1415 = vmatprep.mubr.msk.bf16.mxu1 %vm1814_vm0, %v1813_v0 }
  0x6f   :  { %1401 = vmatprep.subr.bf16.mxu1 %v1813_v0  ;;  %1434 = vmatpush3.bf16.msra.mxu0 %v1598_v34  ;;  %v1628_v34 = vld [vmem:[#allocation7 + $0x28] sm:$0xff]  }
  0x70   :  { %1459 = vmatprep.subr.bf16.mxu0 %v1813_v0 }
  0x72   :  { %1402 = vmatpush3.bf16.msra.mxu1 %v1584_v12 }
  0x73   :  { %1403 = vmatprep.subr.bf16.mxu1 %v1813_v0 }
  0x76   :  { %1404 = vmatpush3.bf16.msra.mxu1 %v1585_v13 }
  0x77   :  { %1405 = vmatprep.subr.bf16.mxu1 %v1813_v0 }
  0x7a   :  { %1406 = vmatpush3.bf16.msra.mxu1 %v1586_v14 }
  0x7b   :  { %1407 = vmatprep.subr.bf16.mxu1 %v1813_v0 }
  0x7e   :  { %1408 = vmatpush3.bf16.msra.mxu1 %v1587_v15 }
  0x7f   :  { %1409 = vmatprep.subr.bf16.mxu1 %v1813_v0 }
  0x82   :  { %1410 = vmatpush3.bf16.msra.mxu1 %v1588_v16  ;;  %v1619_v16 = vld [vmem:[#allocation7 + $0x20] sm:$0xff]  }
  0x83   :  { %1411 = vmatprep.subr.bf16.mxu1 %v1813_v0 }
  0x86   :  { %1412 = vmatpush3.bf16.msra.mxu1 %v1589_v17  ;;  %v1620_v17 = vld [vmem:[#allocation7 + $0x28] sm:$0xff]  }
  0x87   :  { %1413 = vmatprep.subr.bf16.mxu1 %v1813_v0 }
  0x8a   :  { %1414 = vmatpush3.bf16.msra.mxu1 %v1590_v18  ;;  %v1621_v18 = vld [vmem:[#allocation7 + $0x30] sm:$0xff]  }
  0x8b   :  { %1439 = vmatprep.subr.bf16.mxu1 %v1813_v0 }
 0x140   :  { %v185_v24 = vpop.f32.mrb[0].mxu1 }
 0x141   :  { %v191_v25 = vadd.f32 %v185_v24, %v85_v23  ;;  %v1397_v26 = vpop.f32.mrb[1].mxu1  ;;  %v1626_v23 = vld [vmem:[#allocation7 + $0x18] sm:$0xff]   ;;  %v552_v24 = vld [vmem:[#allocation4 + $0x20] sm:$0xff] }
 0x142   :  { %v188_v27 = vpop.f32.mrb[2].mxu1 }
 0x143   :  { %1647 = vtanh.f32 %v191_v25  ;;  %v1398_v28 = vpop.f32.mrb[3].mxu1 }
 0x14d   :  { %v1944_v29 = vpop.eup %1647 }
 0x14e   :  { %v202_v30 = vpack.c.bf16 %v1944_v29, %v1944_v29 }
 0x150   :  { %1416 = vmatmul.mubr.bf16.vlgmr.msra.gmra.mrb[4].mxu1 %v202_v30 }
 0x151   :  { %1455 = vmatprep.mubr.msk.bf16.mxu1 %vm1814_vm0, %v1813_v0  ;;  %1440 = vmatpush3.bf16.msra.mxu1 %v1599_v35  ;;  %v1629_v35 = vld [vmem:[#allocation7 + $0x30] sm:$0xff]  }
 0x152   :  { %1441 = vmatprep.subr.bf16.mxu1 %v1813_v0 }
 0x155   :  { %1442 = vmatpush3.bf16.msra.mxu1 %v1600_v36  ;;  %v1630_v36 = vld [vmem:[#allocation7 + $0x38] sm:$0xff]  }
 0x156   :  { %1443 = vmatprep.subr.bf16.mxu1 %v1813_v0 }
 0x159   :  { %1444 = vmatpush3.bf16.msra.mxu1 %v1601_v37  ;;  %v1631_v37 = vld [vmem:[#allocation10] sm:$0xff]  }
 0x15a   :  { %1445 = vmatprep.subr.bf16.mxu1 %v1813_v0 }
 0x15d   :  { %1446 = vmatpush3.bf16.msra.mxu1 %v1602_v38  ;;  %v1639_v38 = vld [vmem:[#allocation7] sm:$0xff]  }
 0x15e   :  { %1447 = vmatprep.subr.bf16.mxu1 %v1813_v0 }
 0x161   :  { %1448 = vmatpush3.bf16.msra.mxu1 %v1603_v47 }
 0x162   :  { %1449 = vmatprep.subr.bf16.mxu1 %v1813_v0 }
 0x165   :  { %1450 = vmatpush3.bf16.msra.mxu1 %v1604_v48 }
 0x166   :  { %1451 = vmatprep.subr.bf16.mxu1 %v1813_v0 }
 0x169   :  { %1452 = vmatpush3.bf16.msra.mxu1 %v1605_v49 }
 0x16a   :  { %1453 = vmatprep.subr.bf16.mxu1 %v1813_v0 }
 0x16d   :  { %1454 = vmatpush3.bf16.msra.mxu1 %v1606_v50 }
 0x16e   :  { %1479 = vmatprep.subr.bf16.mxu1 %v1813_v0 }
 0x223   :  { %v301_v40 = vpop.f32.mrb[4].mxu1 }
 0x224   :  { %v307_v41 = vadd.f32 %v301_v40, %v201_v39  ;;  %v1417_v42 = vpop.f32.mrb[5].mxu1  ;;  %v1640_v39 = vld [vmem:[#allocation7 + $0x8] sm:$0xff]   ;;  %v1641_v40 = vld [vmem:[#allocation7 + $0x10] sm:$0xff]  }
 0x225   :  { %v304_v43 = vpop.f32.mrb[6].mxu1  ;;  %v669_v42 = vld [vmem:[#allocation4 + $0x28] sm:$0xff] }
 0x226   :  { %1649 = vtanh.f32 %v307_v41  ;;  %v1418_v44 = vpop.f32.mrb[7].mxu1  ;;  %v1642_v41 = vld [vmem:[#allocation7 + $0x18] sm:$0xff]  }
 0x230   :  { %v1958_v45 = vpop.eup %1649 }
 0x231   :  { %v319_v46 = vpack.c.bf16 %v1958_v45, %v1958_v45 }
 0x233   :  { %1436 = vmatmul.mubr.bf16.vlgmr.msra.gmra.mrb[0].mxu0 %v319_v46 }
 0x234   :  { %1475 = vmatprep.mubr.msk.bf16.mxu0 %vm1814_vm0, %v1813_v0  ;;  %1460 = vmatpush3.bf16.msra.mxu0 %v1607_v51  ;;  %v1632_v51 = vld [vmem:[#allocation10 + $0x8] sm:$0xff]  }
 0x235   :  { %1461 = vmatprep.subr.bf16.mxu0 %v1813_v0 }
 0x238   :  { %1462 = vmatpush3.bf16.msra.mxu0 %v1608_v52  ;;  %v1028_v52 = vpack.c.bf16 %v1958_v45, %v1944_v29  ;;  %v1638_v29 = vld [vmem:[#allocation10 + $0x38] sm:$0xff]  }
 0x239   :  { %1463 = vmatprep.subr.bf16.mxu0 %v1813_v0 }
 0x23c   :  { %1464 = vmatpush3.bf16.msra.mxu0 %v1609_v53  ;;  %v1633_v53 = vld [vmem:[#allocation10 + $0x10] sm:$0xff]  }
 0x23d   :  { %1465 = vmatprep.subr.bf16.mxu0 %v1813_v0 }
 0x240   :  { %1466 = vmatpush3.bf16.msra.mxu0 %v1610_v54  ;;  %v1634_v54 = vld [vmem:[#allocation10 + $0x18] sm:$0xff]  }
 0x241   :  { %1467 = vmatprep.subr.bf16.mxu0 %v1813_v0 }
 0x244   :  { %1468 = vmatpush3.bf16.msra.mxu0 %v1611_v63  ;;  %v1646_v63 = vld [vmem:[#allocation7 + $0x38] sm:$0xff]  }
 0x245   :  { %1469 = vmatprep.subr.bf16.mxu0 %v1813_v0 }
 0x248   :  { %1470 = vmatpush3.bf16.msra.mxu0 %v1612_v1  ;;  %v786_v1 = vld [vmem:[#allocation4 + $0x30] sm:$0xff] }
 0x249   :  { %1471 = vmatprep.subr.bf16.mxu0 %v1813_v0 }
 0x24c   :  { %1472 = vmatpush3.bf16.msra.mxu0 %v1613_v2 }
 0x24d   :  { %1473 = vmatprep.subr.bf16.mxu0 %v1813_v0 }
 0x250   :  { %1474 = vmatpush3.bf16.msra.mxu0 %v1614_v3 }
 0x251   :  { %1499 = vmatprep.subr.bf16.mxu0 %v1813_v0 }
 0x306   :  { %v418_v56 = vpop.f32.mrb[0].mxu0 }
 0x307   :  { %v424_v57 = vadd.f32 %v418_v56, %v318_v55  ;;  %v1437_v58 = vpop.f32.mrb[1].mxu0  ;;  %v1635_v55 = vld [vmem:[#allocation10 + $0x20] sm:$0xff]   ;;  %v1636_v56 = vld [vmem:[#allocation10 + $0x28] sm:$0xff]  }
 0x308   :  { %v421_v59 = vpop.f32.mrb[2].mxu0 }
 0x309   :  { %1651 = vtanh.f32 %v424_v57  ;;  %v1438_v60 = vpop.f32.mrb[3].mxu0  ;;  %v1637_v57 = vld [vmem:[#allocation10 + $0x30] sm:$0xff]   ;;  %v1643_v59 = vld [vmem:[#allocation7 + $0x20] sm:$0xff]  }
 0x30a   :  { %v1644_v60 = vld [vmem:[#allocation7 + $0x28] sm:$0xff]  }
 0x313   :  { %v1972_v61 = vpop.eup %1651 }
 0x314   :  { %v436_v62 = vpack.c.bf16 %v1972_v61, %v1972_v61 }
 0x316   :  { %1456 = vmatmul.mubr.bf16.vlgmr.msra.gmra.mrb[8].mxu1 %v436_v62  ;;  %v1645_v62 = vld [vmem:[#allocation7 + $0x30] sm:$0xff]  }
 0x317   :  { %1495 = vmatprep.mubr.msk.bf16.mxu1 %vm1814_vm0, %v1813_v0  ;;  %1480 = vmatpush3.bf16.msra.mxu1 %v1615_v4 }
 0x318   :  { %1481 = vmatprep.subr.bf16.mxu1 %v1813_v0 }
 0x31b   :  { %1482 = vmatpush3.bf16.msra.mxu1 %v1616_v5 }
 0x31c   :  { %1483 = vmatprep.subr.bf16.mxu1 %v1813_v0 }
 0x31f   :  { %1484 = vmatpush3.bf16.msra.mxu1 %v1617_v6 }
 0x320   :  { %1485 = vmatprep.subr.bf16.mxu1 %v1813_v0 }
 0x323   :  { %1486 = vmatpush3.bf16.msra.mxu1 %v1618_v7 }
 0x324   :  { %1487 = vmatprep.subr.bf16.mxu1 %v1813_v0 }
 0x327   :  { %1488 = vmatpush3.bf16.msra.mxu1 %v1619_v16  ;;  %v903_v16 = vld [vmem:[#allocation4 + $0x38] sm:$0xff] }
 0x328   :  { %1489 = vmatprep.subr.bf16.mxu1 %v1813_v0 }
 0x32b   :  { %1490 = vmatpush3.bf16.msra.mxu1 %v1620_v17 }
 0x32c   :  { %1491 = vmatprep.subr.bf16.mxu1 %v1813_v0 }
 0x32f   :  { %1492 = vmatpush3.bf16.msra.mxu1 %v1621_v18 }
 0x330   :  { %1493 = vmatprep.subr.bf16.mxu1 %v1813_v0 }
 0x333   :  { %1494 = vmatpush3.bf16.msra.mxu1 %v1622_v19 }
 0x334   :  { %1519 = vmatprep.subr.bf16.mxu1 %v1813_v0 }
 0x3e9   :  { %v535_v9 = vpop.f32.mrb[8].mxu1 }
 0x3ea   :  { %v541_v10 = vadd.f32 %v535_v9, %v435_v8  ;;  %v1457_v11 = vpop.f32.mrb[9].mxu1  ;;  %v1294_v8 = vld [vmem:[%s2055_s4] ss:$0 sm:$0xff]  ;;  %s1815_s4 = smov [#allocation13]  }
 0x3eb   :  { %v538_v12 = vpop.f32.mrb[10].mxu1  ;;  %s1207_s8 = sshll.u32 %s1815_s4, 4  ;;  %s1208_s8 = int_to_ptr.vmem [resolvable:$true] %s1207_s8 }
 0x3ec   :  { %1653 = vtanh.f32 %v541_v10  ;;  %v1458_v13 = vpop.f32.mrb[11].mxu1  ;;  %s1751_s25 = scalar_lea.vmem %s1208_s8, 128  ;;  %p1756_p5 = scmp.lt.s32.totalorder %s1208_s8, %s1208_s8 }
 0x3ed   :  { %p1752_p4 = scmp.ne.s32.totalorder %s1208_s8, %s1751_s25  ;;  %p1757_p6 = scmp.lt.s32.totalorder %s1751_s25, %s1751_s25 }
 0x3ef   :  { %p1758_p7 = por %p1757_p6, %p1756_p5 }
 0x3f1   :  { %p1759_p8 = pnand %p1758_p7, %p1752_p4 }
 0x3f6   :  { %v1986_v14 = vpop.eup %1653 }
 0x3f7   :  { %v553_v15 = vpack.c.bf16 %v1986_v14, %v1986_v14  ;;  %v1029_v45 = vpack.c.bf16 %v1986_v14, %v1972_v61 }
 0x3f9   :  { %1476 = vmatmul.mubr.bf16.vlgmr.msra.gmra.mrb[4].mxu0 %v553_v15 }
 0x3fa   :  { %1515 = vmatprep.mubr.msk.bf16.mxu0 %vm1814_vm0, %v1813_v0  ;;  %1500 = vmatpush3.bf16.msra.mxu0 %v1623_v20 }
 0x3fb   :  { %1501 = vmatprep.subr.bf16.mxu0 %v1813_v0 }
 0x3fe   :  { %1502 = vmatpush3.bf16.msra.mxu0 %v1624_v21 }
 0x3ff   :  { %1503 = vmatprep.subr.bf16.mxu0 %v1813_v0 }
 0x402   :  { %1504 = vmatpush3.bf16.msra.mxu0 %v1625_v22 }
 0x403   :  { %1505 = vmatprep.subr.bf16.mxu0 %v1813_v0 }
 0x406   :  { %1506 = vmatpush3.bf16.msra.mxu0 %v1626_v23 }
 0x407   :  { %1507 = vmatprep.subr.bf16.mxu0 %v1813_v0 }
 0x40a   :  { %1508 = vmatpush3.bf16.msra.mxu0 %v1627_v33 }
 0x40b   :  { %1509 = vmatprep.subr.bf16.mxu0 %v1813_v0 }
 0x40e   :  { %1510 = vmatpush3.bf16.msra.mxu0 %v1628_v34 }
 0x40f   :  { %1511 = vmatprep.subr.bf16.mxu0 %v1813_v0 }
 0x412   :  { %1512 = vmatpush3.bf16.msra.mxu0 %v1629_v35 }
 0x413   :  { %1513 = vmatprep.subr.bf16.mxu0 %v1813_v0 }
 0x416   :  { %1514 = vmatpush3.bf16.msra.mxu0 %v1630_v36 }
 0x417   :  { %1539 = vmatprep.subr.bf16.mxu0 %v1631_v37 }
 0x4cc   :  { %v652_v25 = vpop.f32.mrb[4].mxu0 }
 0x4cd   :  { %v658_v26 = vadd.f32 %v652_v25, %v552_v24  ;;  %v1477_v27 = vpop.f32.mrb[5].mxu0 }
 0x4ce   :  { %v655_v28 = vpop.f32.mrb[6].mxu0 }
 0x4cf   :  { %1655 = vtanh.f32 %v658_v26  ;;  %v1478_v30 = vpop.f32.mrb[7].mxu0 }
 0x4d9   :  { %v2000_v31 = vpop.eup %1655 }
 0x4da   :  { %v670_v32 = vpack.c.bf16 %v2000_v31, %v2000_v31 }
 0x4dc   :  { %1496 = vmatmul.mubr.bf16.vlgmr.msra.gmra.mrb[12].mxu1 %v670_v32 }
 0x4dd   :  { %1535 = vmatprep.mubr.msk.bf16.mxu1 %vm1814_vm0, %v1813_v0  ;;  %1520 = vmatpush3.bf16.msra.mxu1 %v1639_v38 }
 0x4de   :  { %1521 = vmatprep.subr.bf16.mxu1 %v1813_v0 }
 0x4e1   :  { %1522 = vmatpush3.bf16.msra.mxu1 %v1640_v39 }
 0x4e2   :  { %1523 = vmatprep.subr.bf16.mxu1 %v1813_v0 }
 0x4e5   :  { %1524 = vmatpush3.bf16.msra.mxu1 %v1641_v40 }
 0x4e6   :  { %1525 = vmatprep.subr.bf16.mxu1 %v1813_v0 }
 0x4e9   :  { %1526 = vmatpush3.bf16.msra.mxu1 %v1642_v41 }
 0x4ea   :  { %1527 = vmatprep.subr.bf16.mxu1 %v1813_v0 }
 0x4ed   :  { %1528 = vmatpush3.bf16.msra.mxu1 %v1643_v59 }
 0x4ee   :  { %1529 = vmatprep.subr.bf16.mxu1 %v1813_v0 }
 0x4f1   :  { %1530 = vmatpush3.bf16.msra.mxu1 %v1644_v60 }
 0x4f2   :  { %1531 = vmatprep.subr.bf16.mxu1 %v1813_v0 }
 0x4f5   :  { %1532 = vmatpush3.bf16.msra.mxu1 %v1645_v62 }
 0x4f6   :  { %1533 = vmatprep.subr.bf16.mxu1 %v1813_v0 }
 0x4f9   :  { %1534 = vmatpush3.bf16.msra.mxu1 %v1646_v63 }
 0x5af   :  { %v769_v43 = vpop.f32.mrb[12].mxu1 }
 0x5b0   :  { %v775_v44 = vadd.f32 %v769_v43, %v669_v42  ;;  %v1497_v46 = vpop.f32.mrb[13].mxu1 }
 0x5b1   :  { %v772_v47 = vpop.f32.mrb[14].mxu1 }
 0x5b2   :  { %1657 = vtanh.f32 %v775_v44  ;;  %v1498_v48 = vpop.f32.mrb[15].mxu1 }
 0x5bc   :  { %v1658_v49 = vpop.eup %1657 }
 0x5bd   :  { %v787_v50 = vpack.c.bf16 %v1658_v49, %v1658_v49  ;;  %v1030_v58 = vpack.c.bf16 %v1658_v49, %v2000_v31 }
 0x5bf   :  { %1516 = vmatmul.mubr.bf16.vlgmr.msra.gmra.mrb[8].mxu0 %v787_v50 }
 0x5c0   :  { %1540 = vmatpush3.bf16.msra.mxu0 %v1631_v37  ;;  %1555 = vmatprep.mubr.bf16.mxu0 %v1028_v52 }
 0x5c1   :  { %1541 = vmatprep.subr.bf16.mxu0 %v1632_v51 }
 0x5c4   :  { %1542 = vmatpush3.bf16.msra.mxu0 %v1632_v51 }
 0x5c5   :  { %1543 = vmatprep.subr.bf16.mxu0 %v1633_v53 }
 0x5c8   :  { %1544 = vmatpush3.bf16.msra.mxu0 %v1633_v53 }
 0x5c9   :  { %1545 = vmatprep.subr.bf16.mxu0 %v1634_v54 }
 0x5cc   :  { %1546 = vmatpush3.bf16.msra.mxu0 %v1634_v54 }
 0x5cd   :  { %1547 = vmatprep.subr.bf16.mxu0 %v1635_v55 }
 0x5d0   :  { %1548 = vmatpush3.bf16.msra.mxu0 %v1635_v55 }
 0x5d1   :  { %1549 = vmatprep.subr.bf16.mxu0 %v1636_v56 }
 0x5d4   :  { %1550 = vmatpush3.bf16.msra.mxu0 %v1636_v56 }
 0x5d5   :  { %1551 = vmatprep.subr.bf16.mxu0 %v1637_v57 }
 0x5d8   :  { %1552 = vmatpush3.bf16.msra.mxu0 %v1637_v57 }
 0x5d9   :  { %1553 = vmatprep.subr.bf16.mxu0 %v1638_v29 }
 0x5dc   :  { %1554 = vmatpush3.bf16.msra.mxu0 %v1638_v29 }
 0x5df   :  { %1556 = vmatmul.mubr.bf16.vlgmr.msra.gmra.mrb[12].mxu0 %v1029_v45 }
 0x5e0   :  { %1559 = vmatprep.mubr.bf16.mxu0 %v1030_v58 }
 0x692   :  { %v886_v61 = vpop.f32.mrb[8].mxu0 }
 0x693   :  { %v892_v2 = vadd.f32 %v886_v61, %v786_v1  ;;  %v1517_v3 = vpop.f32.mrb[9].mxu0 }
 0x694   :  { %v889_v4 = vpop.f32.mrb[10].mxu0 }
 0x695   :  { %1659 = vtanh.f32 %v892_v2  ;;  %v1518_v5 = vpop.f32.mrb[11].mxu0 }
 0x69f   :  { %v1660_v6 = vpop.eup %1659 }
 0x6a0   :  { %v904_v7 = vpack.c.bf16 %v1660_v6, %v1660_v6 }
 0x6a2   :  { %1536 = vmatmul.mubr.bf16.vlgmr.msra.gmra.mrb[16].mxu1 %v904_v7 }
 0x6b2   :  { %v1557_v9 = vpop.f32.mrb[12].mxu0 }
 0x6b3   :  { %v1170_v10 = vadd.f32 %v1557_v9, %v1294_v8  ;;  %v1130_v11 = vpop.f32.mrb[13].mxu0 }
 0x6b4   :  { %v1168_v12 = vadd.f32 %v1294_v8, %v1130_v11  ;;  %v1558_v0 = vpop.f32.mrb[14].mxu0 }
 0x6b5   :  { %1178 = vst [vmem:[#allocation12 + $0x10] sm:$0xff] %v1170_v10  ;;  %v1171_v13 = vadd.f32 %v1558_v0, %v1294_v8  ;;  %v1133_v14 = vpop.f32.mrb[15].mxu0 }
 0x6b6   :  { %1176 = vst [vmem:[#allocation12] sm:$0xff] %v1168_v12  ;;  %v1169_v15 = vadd.f32 %v1294_v8, %v1133_v14 }
 0x6b7   :  { %1179 = vst [vmem:[#allocation12 + $0x18] sm:$0xff] %v1171_v13 }
 0x6b8   :  { %1177 = vst [vmem:[#allocation12 + $0x8] sm:$0xff] %v1169_v15 }
 0x775   :  { %v1003_v17 = vpop.f32.mrb[16].mxu1 }
 0x776   :  { %v1009_v18 = vadd.f32 %v1003_v17, %v903_v16  ;;  %v1537_v19 = vpop.f32.mrb[17].mxu1 }
 0x777   :  { %v1006_v20 = vpop.f32.mrb[18].mxu1 }
 0x778   :  { %1661 = vtanh.f32 %v1009_v18  ;;  %v1538_v21 = vpop.f32.mrb[19].mxu1 }
 0x782   :  { %v1662_v22 = vpop.eup %1661 }
 0x783   :  { %1188 = vst [vmem:[#allocation13] sm:$0xff] %v1662_v22  ;;  %v1031_v23 = vpack.c.bf16 %v1662_v22, %v1660_v6 }
 0x785   :  { %1560 = vmatmul.mubr.bf16.gmra.mrb[16].mxu0 %v1031_v23 }
 0x786   :  { %1762 = shalt.err (!%p1759_p8)
}
 0x787   :  { %s1763_s28 = scalar_lea.hbm %s2057_s6, 128 }
 0x788   :  { %p1764_p9 = scmp.ne.s32.totalorder %s2057_s6, %s1763_s28  ;;  %p1767_p10 = scmp.lt.u32.totalorder %s1763_s28, %s2057_s6 }
 0x78a   :  { %p1769_p11 = pnand %p1767_p10, %p1764_p9 }
 0x78c   :  { %1772 = shalt.err (!%p1769_p11)
}
 0x78d   :  { %1210 = dma.vmem_to_hbm [thread:$0]  %s1208_s8, 128, %s2057_s6, [#allocation14]  }
 0x78e   :  { %s1816_s0 = smov [#allocation12]  }
 0x78f   :  { %s1194_s12 = sshll.u32 %s1816_s0, 4  ;;  %s1195_s12 = int_to_ptr.vmem [resolvable:$true] %s1194_s12 }
 0x790   :  { %s1773_s14 = scalar_lea.vmem %s1195_s12, 1024  ;;  %p1778_p13 = scmp.lt.s32.totalorder %s1195_s12, %s1195_s12 }
 0x791   :  { %p1774_p12 = scmp.ne.s32.totalorder %s1195_s12, %s1773_s14  ;;  %p1779_p0 = scmp.lt.s32.totalorder %s1773_s14, %s1773_s14 }
 0x793   :  { %p1780_p1 = por %p1779_p0, %p1778_p13 }
 0x795   :  { %p1781_p2 = pnand %p1780_p1, %p1774_p12 }
 0x858   :  { %v1561_v24 = vpop.f32.mrb[16].mxu0 }
 0x859   :  { %v1174_v25 = vadd.f32 %v1561_v24, %v1294_v8  ;;  %v1146_v26 = vpop.f32.mrb[17].mxu0 }
 0x85a   :  { %v1172_v27 = vadd.f32 %v1294_v8, %v1146_v26  ;;  %v1562_v28 = vpop.f32.mrb[18].mxu0 }
 0x85b   :  { %1182 = vst [vmem:[#allocation12 + $0x30] sm:$0xff] %v1174_v25  ;;  %v1175_v30 = vadd.f32 %v1562_v28, %v1294_v8  ;;  %v1149_v31 = vpop.f32.mrb[19].mxu0 }
 0x85c   :  { %1180 = vst [vmem:[#allocation12 + $0x20] sm:$0xff] %v1172_v27  ;;  %v1173_v32 = vadd.f32 %v1294_v8, %v1149_v31 }
 0x85d   :  { %1183 = vst [vmem:[#allocation12 + $0x38] sm:$0xff] %v1175_v30 }
 0x85e   :  { %1181 = vst [vmem:[#allocation12 + $0x28] sm:$0xff] %v1173_v32 }
 0x85f   :  { %1784 = shalt.err (!%p1781_p2)
}
 0x860   :  { %s1785_s16 = scalar_lea.hbm %s2056_s5, 1024 }
 0x861   :  { %p1786_p3 = scmp.ne.s32.totalorder %s2056_s5, %s1785_s16  ;;  %p1789_p4 = scmp.lt.u32.totalorder %s1785_s16, %s2056_s5 }
 0x863   :  { %p1791_p5 = pnand %p1789_p4, %p1786_p3 }
 0x865   :  { %1794 = shalt.err (!%p1791_p5)
}
 0x866   :  { %1200 = dma.vmem_to_hbm [thread:$0]  %s1195_s12, 1024, %s2056_s5, [#allocation6], %s1809_s1, %s1809_s1, %s1810_s21  }
 0x867   :  { %1801 = dma.done.wait [#allocation6], 1024  }
 0x868   :  { %1802 = vsyncadd [#allocation6], 4294966272 }
 0x869   :  { %1803 = dma.done.wait [#allocation14], 128  }
 0x86a   :  { %1804 = vsyncadd [#allocation14], 4294967168 }
 0x86b   :  { %1217 = vsyncpa [#allocation5], 1 }
 0x86c   :  { %1218 = vsyncpa [#allocation8], 1 }
 0x86d   :  { %1219 = vsyncpa [#allocation11], 1 }
 0x86e   :  { %1220 = vsyncpa [#allocation6], 1 }
 0x86f   :  { %1221 = vsyncpa [#allocation14], 1 }

</bundles_post_ra>
